<compile_context>
chip_gen: v5e
topology: v5e:2x2
jax: 0.10.0
libtpu: 0.0.40
codegen_flags: <defaults>
</compile_context>

<pallas_src>
import functools

import jax
import jax.numpy as jnp
from jax import lax
from jax.experimental import pallas as pl
from jax.experimental.pallas import tpu as pltpu


def _round_up(x, m):
    return (x + m - 1) // m * m


def _attn_general_kernel(hid_ref, enc_ref, w_ref, out_ref, v_ref, *, seq_len, ts):
    i = pl.program_id(0)

    # v = hidden[-1, 0] @ W, computed once and kept resident in VMEM scratch.
    @pl.when(i == 0)
    def _():
        hid = hid_ref[0]                               # (1, H)
        v = jnp.dot(hid, w_ref[...], preferred_element_type=jnp.float32)
        v_ref[...] = v.astype(v_ref.dtype)

    # Per-tile scores: (1, Ts) = v (1, H) x enc_tile (Ts, H), contracted over H.
    scores = lax.dot_general(
        v_ref[...],
        enc_ref[...],
        dimension_numbers=(((1,), (1,)), ((), ())),
        preferred_element_type=jnp.float32,
    )

    # The (1, S_pad) output block is resident across the whole grid (constant
    # out index_map); use it directly as the lane-dense score accumulator.
    start = pl.multiple_of(i * ts, 128)
    out_ref[:, pl.ds(start, ts)] = scores.astype(out_ref.dtype)

    # Final step: mask padded tail with -inf, softmax in f32, exact division.
    @pl.when(i == pl.num_programs(0) - 1)
    def _():
        s = out_ref[...]                                       # (1, S_pad)
        idx = lax.broadcasted_iota(jnp.int32, s.shape, 1)
        s = jnp.where(idx < seq_len, s, -jnp.inf)
        m = jnp.max(s, axis=-1, keepdims=True)
        p = jnp.exp(s - m)
        denom = jnp.sum(p, axis=-1, keepdims=True)
        out_ref[...] = (p / denom).astype(out_ref.dtype)


def attn_general(hidden, encoder_outputs, weight, bias=None, *, compute_dtype=None):
    """Pallas equivalent of Attn(method='general').forward.

    hidden:          (num_layers, 1, H) float32
    encoder_outputs: (S, H) float32
    weight:          (H, H) float32   (nn.Linear weight, out x in)
    bias:            (H,)   float32   NOTE: unused. <hid, b> is a uniform shift
                                      of every score and cancels exactly in the
                                      softmax, so the returned attention weights
                                      are identical to the PyTorch module's.
    compute_dtype:   optional dtype for the streamed matmul operands (e.g.
                     jnp.bfloat16 to halve HBM traffic); softmax stays in f32.
    returns:         (1, 1, S) float32 attention weights (softmax over S)
    """
    del bias  # mathematically redundant for the softmax output
    num_layers = hidden.shape[0]
    S, H = encoder_outputs.shape

    cd = jnp.dtype(compute_dtype) if compute_dtype is not None else jnp.dtype(
        encoder_outputs.dtype)
    itemsize = cd.itemsize

    # ---- Tile sizing over S: multiple of 128, ~512 rows (HBM-roofline sweet
    # spot), capped so double-buffered enc tiles stay within ~16 MiB of VMEM.
    ts = min(512, _round_up(S, 128))
    enc_tile_budget = 16 * 1024 * 1024
    max_ts = max(128, (enc_tile_budget // (2 * max(H, 1) * itemsize)) // 128 * 128)
    ts = max(128, min(ts, max_ts))
    s_pad = _round_up(S, ts)
    num_tiles = s_pad // ts

    # Pad the sequence axis so every tile (and the lane-dense (1, S_pad) output)
    # is full; padded rows are masked with -inf inside the kernel.
    enc = encoder_outputs
    if s_pad != S:
        enc = jnp.pad(enc, ((0, s_pad - S), (0, 0)))
    enc = enc.astype(cd)
    hid = hidden.astype(cd)
    w = weight.astype(cd)

    # ---- Explicit VMEM budget for the resident set (v7x-safe: capped 64 MiB).
    lane_h = _round_up(H, 128)
    need = (
        2 * ts * lane_h * itemsize        # enc tiles (double-buffered)
        + 2 * H * lane_h * itemsize       # W (resident)
        + 2 * 8 * lane_h * itemsize       # hid block (sublane-padded)
        + 2 * 8 * s_pad * 4               # resident (1, S_pad) f32 output block
        + 8 * lane_h * 4                  # v scratch
    )
    vmem_limit = int(min(max(2 * need, 4 * 1024 * 1024), 64 * 1024 * 1024))

    kernel = functools.partial(_attn_general_kernel, seq_len=S, ts=ts)

    out = pl.pallas_call(
        kernel,
        out_shape=jax.ShapeDtypeStruct((1, s_pad), jnp.float32),
        grid=(num_tiles,),
        in_specs=[
            # Full hidden passed in; index_map selects the last layer.
            pl.BlockSpec((1, 1, H), lambda i: (num_layers - 1, 0, 0)),
            # Encoder outputs streamed over S (automatic double buffering).
            pl.BlockSpec((ts, H), lambda i: (i, 0)),
            # Weight resident across the whole grid.
            pl.BlockSpec((H, H), lambda i: (0, 0)),
        ],
        # Constant out index_map -> output block stays resident in VMEM across
        # the S grid and is written back to HBM once, lane-dense.
        out_specs=pl.BlockSpec((1, s_pad), lambda i: (0, 0)),
        scratch_shapes=[pltpu.VMEM((1, H), cd)],
        compiler_params=pltpu.CompilerParams(
            dimension_semantics=("arbitrary",),  # out block revisited across S
            vmem_limit_bytes=vmem_limit,
        ),
    )(hid, enc, w)

    return out[:, :S].reshape(1, 1, S)


def _attn_general_ref(hidden, encoder_outputs, weight, bias):
    # Pure-JAX reference matching the PyTorch module exactly (bias included).
    hid_vec = hidden[-1, 0]
    energy = encoder_outputs @ weight.T + bias
    scores = jnp.sum(energy * hid_vec[None, :], axis=-1)
    return jax.nn.softmax(scores, axis=0).reshape(1, 1, -1)


if __name__ == "__main__":
    # ---- Small deterministic shapes: seq_len=8, hidden_size=32, num_layers=2.
    S, H, L = 8, 32, 2
    key = jax.random.PRNGKey(0)
    k1, k2, k3, k4 = jax.random.split(key, 4)

    hidden = jax.random.normal(k1, (L, 1, H), dtype=jnp.float32)
    encoder_outputs = jax.random.normal(k2, (S, H), dtype=jnp.float32)
    weight = jax.random.normal(k3, (H, H), dtype=jnp.float32) * (1.0 / jnp.sqrt(H))
    bias = jax.random.normal(k4, (H,), dtype=jnp.float32) * 0.01

    out = jax.block_until_ready(attn_general(hidden, encoder_outputs, weight, bias))
    ref = _attn_general_ref(hidden, encoder_outputs, weight, bias)
    assert out.shape == (1, 1, S)
    assert jnp.allclose(out, ref, atol=1e-5, rtol=1e-5), "mismatch vs reference (f32)"
    assert abs(float(jnp.sum(out)) - 1.0) < 1e-5, "softmax does not sum to 1"

    # ---- Larger case exercising the multi-tile grid + padding/masking path.
    S2, H2 = 1000, 64
    k5, k6, k7, k8 = jax.random.split(jax.random.PRNGKey(1), 4)
    hidden2 = jax.random.normal(k5, (L, 1, H2), dtype=jnp.float32)
    enc2 = jax.random.normal(k6, (S2, H2), dtype=jnp.float32)
    weight2 = jax.random.normal(k7, (H2, H2), dtype=jnp.float32) * (1.0 / jnp.sqrt(H2))
    bias2 = jax.random.normal(k8, (H2,), dtype=jnp.float32) * 0.01

    out2 = jax.block_until_ready(attn_general(hidden2, enc2, weight2, bias2))
    ref2 = _attn_general_ref(hidden2, enc2, weight2, bias2)
    assert out2.shape == (1, 1, S2)
    assert jnp.allclose(out2, ref2, atol=1e-4, rtol=1e-4), "mismatch vs reference (tiled)"
    assert abs(float(jnp.sum(out2)) - 1.0) < 1e-4, "tiled softmax does not sum to 1"

    # ---- bf16 streaming-operand path (HBM-bound optimization); looser tolerance.
    out_bf16 = jax.block_until_ready(
        attn_general(hidden, encoder_outputs, weight, bias,
                     compute_dtype=jnp.bfloat16))
    assert out_bf16.shape == (1, 1, S)
    assert jnp.allclose(out_bf16, ref, atol=5e-2), "mismatch vs reference (bf16)"
    assert abs(float(jnp.sum(out_bf16)) - 1.0) < 1e-3, "bf16 softmax does not sum to 1"

    print("KERNEL_OK")
</pallas_src>

<mosaic_0001>
module attributes {stable_mosaic.version = 11 : i64} {
  func.func @_attn_general_kernel(%arg0: i32, %arg1: memref<1x1x32xf32, #tpu.memory_space<vmem>>, %arg2: memref<128x32xf32, #tpu.memory_space<vmem>>, %arg3: memref<32x32xf32, #tpu.memory_space<vmem>>, %arg4: memref<1x128xf32, #tpu.memory_space<vmem>>, %arg5: memref<1x32xf32, #tpu.memory_space<vmem>>) attributes {dimension_semantics = [#tpu.dimension_semantics<arbitrary>], iteration_bounds = array<i64: 1>, scalar_prefetch = 0 : i64, scratch_operands = 1 : i64, tpu.core_type = #tpu.core_type<tc>, window_params = [{transform_indices = @transform_0, window_bounds = array<i64: 1, 1, 32>}, {transform_indices = @transform_1, window_bounds = array<i64: 128, 32>}, {pipeline_mode = #tpu.pipeline_mode<synchronous>, transform_indices = @transform_2, window_bounds = array<i64: 32, 32>}, {pipeline_mode = #tpu.pipeline_mode<synchronous>, transform_indices = @transform_3, window_bounds = array<i64: 1, 128>}]} {
    %c0_i32 = arith.constant 0 : i32
    %0 = arith.cmpi eq, %arg0, %c0_i32 : i32
    %1 = arith.extui %0 : i1 to i32
    %c0_i32_0 = arith.constant 0 : i32
    %2 = arith.cmpi ne, %1, %c0_i32_0 : i32
    scf.if %2 {
      %c0_7 = arith.constant 0 : index
      %c0_8 = arith.constant 0 : index
      %c0_9 = arith.constant 0 : index
      %13 = vector.load %arg1[%c0_7, %c0_8, %c0_9] : memref<1x1x32xf32, #tpu.memory_space<vmem>>, vector<1x1x32xf32>
      %14 = vector.shape_cast %13 : vector<1x1x32xf32> to vector<1x32xf32>
      %c0_10 = arith.constant 0 : index
      %c0_11 = arith.constant 0 : index
      %15 = vector.load %arg3[%c0_10, %c0_11] : memref<32x32xf32, #tpu.memory_space<vmem>>, vector<32x32xf32>
      %cst_12 = arith.constant dense<0.000000e+00> : vector<1x32xf32>
      %16 = tpu.matmul %14, %15, %cst_12 {dimension_numbers = #tpu.dot_dimension_numbers<[1], [0], [0], [1], [0, 0, 1, 1], [], []>} : vector<1x32xf32>, vector<32x32xf32>, vector<1x32xf32> -> vector<1x32xf32>
      %c0_13 = arith.constant 0 : index
      %c0_14 = arith.constant 0 : index
      %17 = vector.load %arg5[%c0_13, %c0_14] : memref<1x32xf32, #tpu.memory_space<vmem>>, vector<1x32xf32>
      tpu.vector_store %arg5[%c0_13, %c0_14], %16 {strides = array<i32>} : memref<1x32xf32, #tpu.memory_space<vmem>>, vector<1x32xf32>,
    } else {
    }
    %c0 = arith.constant 0 : index
    %c0_1 = arith.constant 0 : index
    %3 = vector.load %arg5[%c0, %c0_1] : memref<1x32xf32, #tpu.memory_space<vmem>>, vector<1x32xf32>
    %c0_2 = arith.constant 0 : index
    %c0_3 = arith.constant 0 : index
    %4 = vector.load %arg2[%c0_2, %c0_3] : memref<128x32xf32, #tpu.memory_space<vmem>>, vector<128x32xf32>
    %cst = arith.constant dense<0.000000e+00> : vector<1x128xf32>
    %5 = tpu.matmul %3, %4, %cst {dimension_numbers = #tpu.dot_dimension_numbers<[1], [1], [0], [0], [0, 0, 1, 0], [], []>} : vector<1x32xf32>, vector<128x32xf32>, vector<1x128xf32> -> vector<1x128xf32>
    %c128_i32 = arith.constant 128 : i32
    %6 = arith.muli %arg0, %c128_i32 : i32
    %7 = tpu.assume_multiple %6, 128 : i32
    %c0_4 = arith.constant 0 : index
    %8 = arith.index_cast %7 : i32 to index
    %9 = vector.load %arg4[%c0_4, %8] : memref<1x128xf32, #tpu.memory_space<vmem>>, vector<1x128xf32>
    tpu.vector_store %arg4[%c0_4, %8], %5 {strides = array<i32>} : memref<1x128xf32, #tpu.memory_space<vmem>>, vector<1x128xf32>,
    %c0_i32_5 = arith.constant 0 : i32
    %10 = arith.cmpi eq, %arg0, %c0_i32_5 : i32
    %11 = arith.extui %10 : i1 to i32
    %c0_i32_6 = arith.constant 0 : i32
    %12 = arith.cmpi ne, %11, %c0_i32_6 : i32
    scf.if %12 {
      %c0_7 = arith.constant 0 : index
      %c0_8 = arith.constant 0 : index
      %13 = vector.load %arg4[%c0_7, %c0_8] : memref<1x128xf32, #tpu.memory_space<vmem>>, vector<1x128xf32>
      %14 = tpu.iota {dimensions = array<i32: 1>} : vector<1x128xi32>
      %c8_i32 = arith.constant 8 : i32
      %15 = vector.broadcast %c8_i32 : i32 to vector<1x128xi32>
      %16 = arith.cmpi slt, %14, %15 : vector<1x128xi32>
      %cst_9 = arith.constant 0xFF800000 : f32
      %17 = vector.broadcast %cst_9 : f32 to vector<1x128xf32>
      %18 = arith.select %16, %13, %17 : vector<1x128xi1>, vector<1x128xf32>
      %cst_10 = arith.constant dense<0xFF800000> : vector<1xf32>
      %19 = vector.multi_reduction <maximumf>, %18, %cst_10 [1] : vector<1x128xf32> to vector<1xf32>
      %20 = vector.shape_cast %19 : vector<1xf32> to vector<1x1xf32>
      %21 = vector.broadcast %20 : vector<1x1xf32> to vector<1x128xf32>
      %22 = arith.subf %18, %21 : vector<1x128xf32>
      %23 = math.exp %22 : vector<1x128xf32>
      %cst_11 = arith.constant dense<0.000000e+00> : vector<1xf32>
      %24 = vector.multi_reduction <add>, %23, %cst_11 [1] : vector<1x128xf32> to vector<1xf32>
      %25 = vector.shape_cast %24 : vector<1xf32> to vector<1x1xf32>
      %26 = vector.broadcast %25 : vector<1x1xf32> to vector<1x128xf32>
      %27 = arith.divf %23, %26 : vector<1x128xf32>
      %c0_12 = arith.constant 0 : index
      %c0_13 = arith.constant 0 : index
      %28 = vector.load %arg4[%c0_12, %c0_13] : memref<1x128xf32, #tpu.memory_space<vmem>>, vector<1x128xf32>
      tpu.vector_store %arg4[%c0_12, %c0_13], %27 {strides = array<i32>} : memref<1x128xf32, #tpu.memory_space<vmem>>, vector<1x128xf32>,
    } else {
    }
    return
  }
  func.func @transform_0(%arg0: i32) -> (i32, i32, i32) {
    %c1_i32 = arith.constant 1 : i32
    %c0_i32 = arith.constant 0 : i32
    %c0_i32_0 = arith.constant 0 : i32
    %c0_i32_1 = arith.constant 0 : i32
    return %c1_i32, %c0_i32, %c0_i32_0 : i32, i32, i32
  }
  func.func @transform_1(%arg0: i32) -> (i32, i32) {
    %c0_i32 = arith.constant 0 : i32
    %c0_i32_0 = arith.constant 0 : i32
    return %arg0, %c0_i32 : i32, i32
  }
  func.func @transform_2(%arg0: i32) -> (i32, i32) {
    %c0_i32 = arith.constant 0 : i32
    %c0_i32_0 = arith.constant 0 : i32
    %c0_i32_1 = arith.constant 0 : i32
    return %c0_i32, %c0_i32_0 : i32, i32
  }
  func.func @transform_3(%arg0: i32) -> (i32, i32) {
    %c0_i32 = arith.constant 0 : i32
    %c0_i32_0 = arith.constant 0 : i32
    %c0_i32_1 = arith.constant 0 : i32
    return %c0_i32, %c0_i32_0 : i32, i32
  }
}

</mosaic_0001>

<bundles_post_ra>
// kernel: tpu_custom_call.1
= control target key start
LH: loop header
LB: loop body
LE: loop exit
PB: predicated region body
PF: predicated region fallthrough
CT: control target
= control target key end

     0   :  { %vm27_vm0 = vcmask 261120   ;;  %s353_s0 = inlined_call_operand.vmem [shape: f32[2,1,32], index: 0, kind: input, shape index: {}]   ;;  %s354_s1 = inlined_call_operand.vmem [shape: f32[128,32], index: 1, kind: input, shape index: {}]   ;;  %s355_s2 = inlined_call_operand.vmem [shape: f32[32,32], index: 2, kind: input, shape index: {}]   ;;  %s356_s3 = inlined_call_operand.hbm [shape: f32[1,128], index: 3, kind: output, shape index: {}]  }
   0x1   :  { %v26_v0 = vld [vmem:[%s355_s2 + $0x18] sm:$0xff]  ;;  %v25_v1 = vld [vmem:[%s355_s2 + $0x10] sm:$0xff]  ;;  %v24_v3 = vld [vmem:[%s355_s2 + $0x8] sm:$0xff] }
   0x2   :  { %43 = vmatpush.msra.mxu0 %v26_v0  ;;  %v69_v2 = vld [vmem:[%s354_s1 + $0x78] sm:$0xff]  ;;  %v68_v4 = vld [vmem:[%s354_s1 + $0x70] sm:$0xff]  ;;  %v23_v5 = vld [vmem:[%s355_s2] sm:$0xff] }
   0x3   :  { %200 = vmatpush.xpose.msk.msra.mxu1 %vm27_vm0, %v69_v2  ;;  %v198_v6 = vld [vmem:[%s353_s0 + $0x1] sm:$0x1] }
   0x4   :  { %44 = vmatpush.msra.mxu0 %v25_v1 }
   0x6   :  { %45 = vmatpush.msra.mxu0 %v24_v3 }
   0x7   :  { %8 = vsyncpa [#allocation4], 0  ;;  %201 = vmatpush.xpose.msk.msra.mxu1 %vm27_vm0, %v68_v4  ;;  %v67_v7 = vld [vmem:[%s354_s1 + $0x68] sm:$0xff]  ;;  %v66_v8 = vld [vmem:[%s354_s1 + $0x60] sm:$0xff]  ;;  %vm51_vm1 = vcmask 253952   ;;  %v151_v23 = vlaneseq  ;;  %vm155_vm3 = vcmask 1040384  }
   0x8   :  { %46 = vmatpush.msra.mxu0 %v23_v5  ;;  %v65_v9 = vld [vmem:[%s354_s1 + $0x58] sm:$0xff]  ;;  %v64_v10 = vld [vmem:[%s354_s1 + $0x50] sm:$0xff]  ;;  %v63_v11 = vld [vmem:[%s354_s1 + $0x48] sm:$0xff]  ;;  %s188_s28 = sshll.u32 %s356_s3, 4  ;;  %s189_s28 = int_to_ptr.hbm [resolvable:$true] %s188_s28 }
   0x9   :  { %199 = vmatmul.msk.f32.vlgmr.msra.gmra.mxu0 %vm27_vm0, %v198_v6  ;;  %v62_v12 = vld [vmem:[%s354_s1 + $0x40] sm:$0xff]  ;;  %v61_v13 = vld [vmem:[%s354_s1 + $0x38] sm:$0xff]  ;;  %v60_v14 = vld [vmem:[%s354_s1 + $0x30] sm:$0xff]  ;;  %v152_v25 = vand.u32 127, %v151_v23 }
   0xa   :  { %v59_v15 = vld [vmem:[%s354_s1 + $0x28] sm:$0xff]  ;;  %v58_v16 = vld [vmem:[%s354_s1 + $0x20] sm:$0xff]  ;;  %v57_v17 = vld [vmem:[%s354_s1 + $0x18] sm:$0xff] }
   0xb   :  { %202 = vmatpush.xpose.msk.msra.mxu1 %vm27_vm0, %v67_v7  ;;  %v56_v18 = vld [vmem:[%s354_s1 + $0x10] sm:$0xff]  ;;  %v55_v19 = vld [vmem:[%s354_s1 + $0x8] sm:$0xff]  ;;  %v54_v20 = vld [vmem:[%s354_s1] sm:$0xff]  ;;  %vm153_vm2 = vcmp.lt.s32.totalorder %v152_v25, 8  ;;  %s248_s1 = smov [#allocation3]  }
   0xc   :  { %s186_s25 = sshll.u32 %s248_s1, 4  ;;  %s187_s25 = int_to_ptr.vmem [resolvable:$true] %s186_s25 }
   0xf   :  { %203 = vmatpush.xpose.msk.msra.mxu1 %vm27_vm0, %v66_v8 }
  0x13   :  { %204 = vmatpush.xpose.msk.msra.mxu1 %vm27_vm0, %v65_v9 }
  0x17   :  { %205 = vmatpush.xpose.msk.msra.mxu1 %vm27_vm0, %v64_v10 }
  0x1b   :  { %206 = vmatpush.xpose.msk.msra.mxu1 %vm27_vm0, %v63_v11 }
  0x1f   :  { %207 = vmatpush.xpose.msk.msra.mxu1 %vm27_vm0, %v62_v12 }
  0x23   :  { %208 = vmatpush.xpose.msk.msra.mxu1 %vm27_vm0, %v61_v13 }
  0x27   :  { %209 = vmatpush.xpose.msk.msra.mxu1 %vm27_vm0, %v60_v14 }
  0x2b   :  { %210 = vmatpush.xpose.msk.msra.mxu1 %vm27_vm0, %v59_v15 }
  0x2f   :  { %211 = vmatpush.xpose.msk.msra.mxu1 %vm27_vm0, %v58_v16 }
  0x33   :  { %212 = vmatpush.xpose.msk.msra.mxu1 %vm27_vm0, %v57_v17 }
  0x37   :  { %213 = vmatpush.xpose.msk.msra.mxu1 %vm27_vm0, %v56_v18 }
  0x3b   :  { %214 = vmatpush.xpose.msk.msra.mxu1 %vm27_vm0, %v55_v19 }
  0x3f   :  { %215 = vmatpush.xpose.msk.msra.mxu1 %vm27_vm0, %v54_v20 }
  0x86   :  { %v48_v21 = vpop.f32.mrf.mxu0 }
  0x87   :  { %52 = vst.msk [vmem:[#allocation2] sm:$0x1] %vm51_vm1, %v48_v21 }
  0x8e   :  { %v53_v22 = vld [vmem:[#allocation2] sm:$0x1] }
  0x8f   :  { %216 = vmatmul.msk.f32.vlgmr.msra.gmra.mxu1 %vm27_vm0, %v53_v22 }
 0x10c   :  { %v139_v24 = vpop.f32.mrf.mxu1 }
 0x10d   :  { %146 = vst [vmem:[#allocation3] sm:$0x1] %v139_v24 }
 0x114   :  { %v150_v26 = vld [vmem:[#allocation3] sm:$0x1] }
 0x115   :  { %v154_v27 = vsel %vm153_vm2, %v150_v26, -inf }
 0x116   :  { %v156_v28 = vsel %vm155_vm3, %v154_v27, -inf }
 0x117   :  { %157 = vmax.xlane.f32.xlu0 %v156_v28 }
 0x18a   :  { %v158_v29 = vpop.xlane.xlu0 %157 }
 0x18b   :  { %v159_v30 = vsub.f32 %v154_v27, %v158_v29 }
 0x18d   :  { %v160_v31 = vmul.f32 1.442695, %v159_v30 }
 0x18f   :  { %218 = vpow2.f32 %v160_v31 }
 0x195   :  { %v219_v32 = vpop.eup %218 }
 0x196   :  { %v162_v33 = vsel %vm155_vm3, %v219_v32, 0.0 }
 0x197   :  { %163 = vadd.xlane.f32.xlu0 %v162_v33 }
 0x20a   :  { %v164_v34 = vpop.xlane.xlu0 %163 }
 0x20b   :  { %220 = vrcp.f32 %v164_v34  ;;  %v176_v38 = vand.u32 2147483648, %v164_v34  ;;  %v174_v40 = vand.u32 2147483647, %v164_v34  ;;  %vm170_vm5 = vweird.f32 %v164_v34 }
 0x20d   :  { %v177_v42 = vor.u32 1.1754944e-38, %v176_v38  ;;  %vm175_vm7 = vcmp.eq.f32.partialorder %v174_v40, 8.507059e+37 }
 0x211   :  { %v221_v35 = vpop.eup %220 }
 0x212   :  { %v166_v36 = vmul.f32 %v221_v35, %v164_v34  ;;  %vm171_vm4 = vweird.f32 %v221_v35 }
 0x213   :  { %vm172_vm6 = vmor %vm170_vm5, %vm171_vm4 }
 0x214   :  { %v167_v37 = vsub.f32 1.0, %v166_v36 }
 0x216   :  { %v168_v39 = vmul.f32 %v221_v35, %v167_v37 }
 0x218   :  { %v169_v41 = vadd.f32 %v221_v35, %v168_v39 }
 0x21a   :  { %v173_v43 = vsel %vm172_vm6, %v221_v35, %v169_v41 }
 0x21b   :  { %v178_v44 = vsel %vm175_vm7, %v177_v42, %v173_v43 }
 0x21c   :  { %v179_v45 = vmul.f32 %v219_v32, %v178_v44 }
 0x21e   :  { %180 = vst [vmem:[#allocation3] sm:$0x1] %v179_v45 }
 0x21f   :  { %191 = dma.vmem_to_hbm [thread:$0]  %s187_s25, 16, %s189_s28, [#allocation4]  }
 0x220   :  { %246 = dma.done.wait [#allocation4], 16  }
 0x221   :  { %247 = vsyncadd [#allocation4], 4294967280 }
 0x222   :  { %196 = vsyncpa [#allocation4], 1 }

</bundles_post_ra>
